<compile_context>
chip_gen: v7x
topology: tpu7x:2x2x1
jax: 0.10.0
libtpu: 0.0.40
codegen_flags: <defaults>
</compile_context>

<pallas_src>
import functools
import math

import numpy as np
import jax
import jax.numpy as jnp
from jax.experimental import pallas as pl
from jax.experimental.pallas import tpu as pltpu  # noqa: F401  (TPU backend)

EPS = 1e-12


# ------------------------------- helpers -------------------------------

def _full_spec(shape):
    """Whole-array block (single grid step); operand lives in VMEM."""
    nd = len(shape)
    return pl.BlockSpec(shape, lambda i, _nd=nd: (0,) * _nd)


# ------------- constant gather / interpolation matrices (trace-time) -------------

@functools.lru_cache(maxsize=None)
def _bilinear_axis_weights(in_size, scale):
    """(out, in) 1-D weights matching F.interpolate(bilinear, align_corners=False)."""
    out_size = int(math.floor(in_size * scale))
    w = np.zeros((out_size, in_size), np.float32)
    for o in range(out_size):
        src = max((o + 0.5) / scale - 0.5, 0.0)
        i0 = min(int(math.floor(src)), in_size - 1)
        i1 = min(i0 + 1, in_size - 1)
        f = src - i0
        w[o, i0] += 1.0 - f
        w[o, i1] += f
    return w


def _crop_rows(mat, rows_out, offset):
    """Center-crop (offset>=0) or zero-pad (offset<0) along the leading axis."""
    out = np.zeros((rows_out, mat.shape[1]), np.float32)
    for r in range(rows_out):
        rr = r + offset
        if 0 <= rr < mat.shape[0]:
            out[r] = mat[rr]
    return out


@functools.lru_cache(maxsize=None)
def resize_matrix(n, h, w, f_h, f_w, ht, wt):
    """(n*h*w, n*ht*wt): flattened separable bilinear resize + center crop/pad."""
    wh = _bilinear_axis_weights(h, f_h)
    ww = _bilinear_axis_weights(w, f_w)
    a = _crop_rows(wh, ht, (wh.shape[0] - ht) // 2)      # (ht, h)
    b = _crop_rows(ww, wt, (ww.shape[0] - wt) // 2)      # (wt, w)
    blk = np.einsum("th,uw->hwtu", a, b).reshape(h * w, ht * wt)
    full = np.zeros((n * h * w, n * ht * wt), np.float32)
    for i in range(n):
        full[i * h * w:(i + 1) * h * w, i * ht * wt:(i + 1) * ht * wt] = blk
    return jnp.asarray(full)


@functools.lru_cache(maxsize=None)
def conv_tap_matrices(n, h, w, s_h, s_w, ht, wt):
    """(9, n*h*w, n*ht*wt) 0/1 gather matrices, one per 3x3 tap, for a stride-(s_h,s_w)
    conv with padding (1,1,1,1), output center-cropped/zero-padded to (ht, wt).
    Out-of-range source positions (the zero padding) contribute nothing."""
    hf = (h - 1) // s_h + 1          # full conv output height: (h + 2 - 3)//s + 1
    wf = (w - 1) // s_w + 1
    ct, cl = (hf - ht) // 2, (wf - wt) // 2
    taps = np.zeros((9, n * h * w, n * ht * wt), np.float32)
    for kh in range(3):
        for kw in range(3):
            k = kh * 3 + kw
            for i in range(n):
                for ho in range(ht):
                    hfo = ho + ct
                    if not (0 <= hfo < hf):
                        continue
                    hi = hfo * s_h + kh - 1
                    if not (0 <= hi < h):
                        continue
                    for wo in range(wt):
                        wfo = wo + cl
                        if not (0 <= wfo < wf):
                            continue
                        wi = wfo * s_w + kw - 1
                        if not (0 <= wi < w):
                            continue
                        taps[k, (i * h + hi) * w + wi, (i * ht + ho) * wt + wo] = 1.0
    return jnp.asarray(taps)


# --------------------------- fused branch kernels ---------------------------

def _bn_train(y, g, b, eps):
    """Training-mode BatchNorm over the lane (N*H*W) axis; two-pass stable variance."""
    mu = jnp.mean(y, axis=1, keepdims=True)
    d = y - mu
    var = jnp.mean(d * d, axis=1, keepdims=True)           # biased variance
    return d * (g * jax.lax.rsqrt(var + eps)) + b


def _downsample_kernel(x_ref, pw_ref, g_ref, b_ref, wc_ref, cb_ref, s_ref,
                       *rest, has_acc, eps):
    """pointwise conv -> BN -> 3x3 strided conv (9 MXU taps) -> +bias -> ReLU -> (+acc)."""
    if has_acc:
        acc_ref, o_ref = rest
    else:
        (o_ref,) = rest
    y = jnp.dot(pw_ref[...], x_ref[...], preferred_element_type=jnp.float32)   # (Co, Min)
    yn = _bn_train(y, g_ref[...], b_ref[...], eps)
    conv = None
    for k in range(9):                                      # static unroll
        shifted = jnp.dot(yn, s_ref[k], preferred_element_type=jnp.float32)    # (Co, Mout)
        term = jnp.dot(wc_ref[k], shifted, preferred_element_type=jnp.float32)
        conv = term if conv is None else conv + term
    res = jnp.maximum(conv + cb_ref[...], 0.0)              # bias + ReLU
    if has_acc:
        res = res + acc_ref[...]
    o_ref[...] = res


def _upsample_kernel(x_ref, pw_ref, g_ref, b_ref, r_ref, *rest, has_acc, eps):
    """pointwise conv -> BN -> bilinear resize (one MXU contraction) -> (+acc)."""
    if has_acc:
        acc_ref, o_ref = rest
    else:
        (o_ref,) = rest
    y = jnp.dot(pw_ref[...], x_ref[...], preferred_element_type=jnp.float32)
    yn = _bn_train(y, g_ref[...], b_ref[...], eps)
    res = jnp.dot(yn, r_ref[...], preferred_element_type=jnp.float32)
    if has_acc:
        res = res + acc_ref[...]
    o_ref[...] = res


def _add_kernel(a_ref, b_ref, o_ref):
    o_ref[...] = a_ref[...] + b_ref[...]


def fused_downsample_branch(x2, p, taps, m_out, acc):
    cout = p["pw_w"].shape[0]
    inputs = [x2, p["pw_w"], p["bn_g"].reshape(cout, 1), p["bn_b"].reshape(cout, 1),
              p["conv_w"], p["conv_b"].reshape(cout, 1), taps]
    if acc is not None:
        inputs.append(acc)
    kern = functools.partial(_downsample_kernel, has_acc=acc is not None, eps=EPS)
    return pl.pallas_call(
        kern,
        out_shape=jax.ShapeDtypeStruct((cout, m_out), jnp.float32),
        grid=(1,),
        in_specs=[_full_spec(a.shape) for a in inputs],
        out_specs=_full_spec((cout, m_out)),
    )(*inputs)


def fused_upsample_branch(x2, p, rmat, m_out, acc):
    cout = p["pw_w"].shape[0]
    inputs = [x2, p["pw_w"], p["bn_g"].reshape(cout, 1), p["bn_b"].reshape(cout, 1), rmat]
    if acc is not None:
        inputs.append(acc)
    kern = functools.partial(_upsample_kernel, has_acc=acc is not None, eps=EPS)
    return pl.pallas_call(
        kern,
        out_shape=jax.ShapeDtypeStruct((cout, m_out), jnp.float32),
        grid=(1,),
        in_specs=[_full_spec(a.shape) for a in inputs],
        out_specs=_full_spec((cout, m_out)),
    )(*inputs)


def pallas_add(a, b):
    return pl.pallas_call(
        _add_kernel,
        out_shape=jax.ShapeDtypeStruct(a.shape, jnp.float32),
        grid=(1,),
        in_specs=[_full_spec(a.shape), _full_spec(b.shape)],
        out_specs=_full_spec(a.shape),
    )(a, b)


# ------------------------------ MixBlock2d ------------------------------

def init_mixblock_params(key, in_channels, additional_channels):
    max_level_in = len(in_channels) - 1
    out_channels = list(in_channels) + ([additional_channels] if additional_channels > 0 else [])
    max_level_out = len(out_channels) - 1
    params = {}
    for idx_out in range(max_level_out + 1):
        cout = out_channels[idx_out]
        for idx_in in range(max_level_in + 1):
            if idx_in == idx_out:
                continue
            cin = in_channels[idx_in]
            key, k1, k2, k3 = jax.random.split(key, 4)
            p = {}
            bpw = 1.0 / math.sqrt(cin)
            p["pw_w"] = jax.random.uniform(k1, (cout, cin), jnp.float32, -bpw, bpw)
            p["bn_g"] = jnp.ones((cout,), jnp.float32)
            p["bn_b"] = jnp.zeros((cout,), jnp.float32)
            if idx_in < idx_out:          # downsample path: 3x3 conv (cout -> cout) + bias
                bc = 1.0 / math.sqrt(cout * 9)
                wconv = jax.random.uniform(k2, (cout, cout, 3, 3), jnp.float32, -bc, bc)
                # (Cout, Cin, 3, 3) -> (9, Cout, Cin), tap index k = kh*3 + kw
                p["conv_w"] = jnp.transpose(wconv, (2, 3, 0, 1)).reshape(9, cout, cout)
                p["conv_b"] = jax.random.uniform(k3, (cout,), jnp.float32, -bc, bc)
            params[(idx_out, idx_in)] = p
    return params, max_level_in, max_level_out


def mixblock2d_forward(inputs_nchw, params, max_level_in, max_level_out, scale=(2, 2)):
    # NCHW -> lane-dense (C, N*H*W) layout once at the boundary.
    xs, meta = [], []
    for x in inputs_nchw:
        n, c, h, w = x.shape
        xs.append(jnp.transpose(x.astype(jnp.float32), (1, 0, 2, 3)).reshape(c, n * h * w))
        meta.append((n, c, h, w))
    n_batch = meta[0][0]

    outputs = []
    for idx_out in range(max_level_out + 1):
        acc, acc_hw = None, None
        for idx_in in range(max_level_in + 1):
            n, c_in, h, w = meta[idx_in]
            if idx_in == idx_out:                      # identity branch
                if acc is None:
                    acc, acc_hw = xs[idx_in], (h, w)
                else:
                    xid = xs[idx_in]
                    if (h, w) != acc_hw:               # rare: center crop / zero-pad to acc size
                        ht, wt = acc_hw
                        pad_t, pad_l = (h - ht) // 2, (w - wt) // 2
                        x4 = xid.reshape(c_in, n, h, w)
                        x4 = jax.lax.pad(x4, jnp.array(0.0, x4.dtype),
                                         ((0, 0, 0), (0, 0, 0),
                                          (-pad_t, -(h - ht - pad_t), 0),
                                          (-pad_l, -(w - wt - pad_l), 0)))
                        xid = x4.reshape(c_in, n * ht * wt)
                    acc = pallas_add(acc, xid)
            elif idx_in < idx_out:                     # downsample branch (fused kernel)
                d = idx_out - idx_in
                s_h, s_w = scale[0] ** d, scale[1] ** d
                p = params[(idx_out, idx_in)]
                hf, wf = (h - 1) // s_h + 1, (w - 1) // s_w + 1
                ht, wt = (hf, wf) if acc is None else acc_hw
                taps = conv_tap_matrices(n, h, w, s_h, s_w, ht, wt)
                acc = fused_downsample_branch(xs[idx_in], p, taps, n * ht * wt, acc)
                if acc_hw is None:
                    acc_hw = (ht, wt)
            else:                                      # upsample branch (fused kernel)
                d = idx_in - idx_out
                f_h, f_w = float(scale[0] ** d), float(scale[1] ** d)
                p = params[(idx_out, idx_in)]
                hf, wf = int(math.floor(h * f_h)), int(math.floor(w * f_w))
                ht, wt = (hf, wf) if acc is None else acc_hw
                rmat = resize_matrix(n, h, w, f_h, f_w, ht, wt)
                acc = fused_upsample_branch(xs[idx_in], p, rmat, n * ht * wt, acc)
                if acc_hw is None:
                    acc_hw = (ht, wt)
        ht, wt = acc_hw
        c_out = acc.shape[0]
        outputs.append(jnp.transpose(acc.reshape(c_out, n_batch, ht, wt), (1, 0, 2, 3)))
    return outputs


if __name__ == "__main__":
    in_channels = [4, 8]          # level 0: 4ch @ 16x16, level 1: 8ch @ 8x8
    additional_channels = 0
    scale = (2, 2)

    key = jax.random.PRNGKey(0)
    kp, kx0, kx1 = jax.random.split(key, 3)
    params, mli, mlo = init_mixblock_params(kp, in_channels, additional_channels)

    x0 = jax.random.normal(kx0, (2, 4, 16, 16), jnp.float32)   # NCHW
    x1 = jax.random.normal(kx1, (2, 8, 8, 8), jnp.float32)     # NCHW

    outs = mixblock2d_forward([x0, x1], params, mli, mlo, scale)
    for o in outs:
        jax.block_until_ready(o)
    assert outs[0].shape == (2, 4, 16, 16)
    assert outs[1].shape == (2, 8, 8, 8)
    print("KERNEL_OK")
</pallas_src>

<mosaic_0001>
module attributes {stable_mosaic.version = 11 : i64} {
  func.func @_upsample_kernel(%arg0: i32, %arg1: memref<8x128xf32, #tpu.memory_space<vmem>>, %arg2: memref<4x8xf32, #tpu.memory_space<vmem>>, %arg3: memref<4x1xf32, #tpu.memory_space<vmem>>, %arg4: memref<4x1xf32, #tpu.memory_space<vmem>>, %arg5: memref<128x512xf32, #tpu.memory_space<vmem>>, %arg6: memref<4x512xf32, #tpu.memory_space<vmem>>, %arg7: memref<4x512xf32, #tpu.memory_space<vmem>>) attributes {dimension_semantics = [#tpu.dimension_semantics<arbitrary>], iteration_bounds = array<i64: 1>, scalar_prefetch = 0 : i64, scratch_operands = 0 : i64, tpu.core_type = #tpu.core_type<tc>, window_params = [{pipeline_mode = #tpu.pipeline_mode<synchronous>, transform_indices = @transform_0, window_bounds = array<i64: 8, 128>}, {pipeline_mode = #tpu.pipeline_mode<synchronous>, transform_indices = @transform_1, window_bounds = array<i64: 4, 8>}, {pipeline_mode = #tpu.pipeline_mode<synchronous>, transform_indices = @transform_2, window_bounds = array<i64: 4, 1>}, {pipeline_mode = #tpu.pipeline_mode<synchronous>, transform_indices = @transform_3, window_bounds = array<i64: 4, 1>}, {pipeline_mode = #tpu.pipeline_mode<synchronous>, transform_indices = @transform_4, window_bounds = array<i64: 128, 512>}, {pipeline_mode = #tpu.pipeline_mode<synchronous>, transform_indices = @transform_5, window_bounds = array<i64: 4, 512>}, {pipeline_mode = #tpu.pipeline_mode<synchronous>, transform_indices = @transform_6, window_bounds = array<i64: 4, 512>}]} {
    %c0 = arith.constant 0 : index
    %c0_0 = arith.constant 0 : index
    %0 = vector.load %arg2[%c0, %c0_0] : memref<4x8xf32, #tpu.memory_space<vmem>>, vector<4x8xf32>
    %c0_1 = arith.constant 0 : index
    %c0_2 = arith.constant 0 : index
    %1 = vector.load %arg1[%c0_1, %c0_2] : memref<8x128xf32, #tpu.memory_space<vmem>>, vector<8x128xf32>
    %cst = arith.constant dense<0.000000e+00> : vector<4x128xf32>
    %2 = tpu.matmul %0, %1, %cst {dimension_numbers = #tpu.dot_dimension_numbers<[1], [0], [0], [1], [0, 0, 1, 1], [], []>} : vector<4x8xf32>, vector<8x128xf32>, vector<4x128xf32> -> vector<4x128xf32>
    %c0_3 = arith.constant 0 : index
    %c0_4 = arith.constant 0 : index
    %3 = vector.load %arg3[%c0_3, %c0_4] : memref<4x1xf32, #tpu.memory_space<vmem>>, vector<4x1xf32>
    %c0_5 = arith.constant 0 : index
    %c0_6 = arith.constant 0 : index
    %4 = vector.load %arg4[%c0_5, %c0_6] : memref<4x1xf32, #tpu.memory_space<vmem>>, vector<4x1xf32>
    %cst_7 = arith.constant dense<0.000000e+00> : vector<4xf32>
    %5 = vector.multi_reduction <add>, %2, %cst_7 [1] : vector<4x128xf32> to vector<4xf32>
    %6 = vector.shape_cast %5 : vector<4xf32> to vector<4x1xf32>
    %cst_8 = arith.constant 1.280000e+02 : f32
    %7 = vector.broadcast %cst_8 : f32 to vector<4x1xf32>
    %8 = arith.divf %6, %7 : vector<4x1xf32>
    %9 = vector.broadcast %8 : vector<4x1xf32> to vector<4x128xf32>
    %10 = arith.subf %2, %9 : vector<4x128xf32>
    %11 = arith.mulf %10, %10 : vector<4x128xf32>
    %cst_9 = arith.constant dense<0.000000e+00> : vector<4xf32>
    %12 = vector.multi_reduction <add>, %11, %cst_9 [1] : vector<4x128xf32> to vector<4xf32>
    %13 = vector.shape_cast %12 : vector<4xf32> to vector<4x1xf32>
    %cst_10 = arith.constant 1.280000e+02 : f32
    %14 = vector.broadcast %cst_10 : f32 to vector<4x1xf32>
    %15 = arith.divf %13, %14 : vector<4x1xf32>
    %cst_11 = arith.constant 9.99999996E-13 : f32
    %16 = vector.broadcast %cst_11 : f32 to vector<4x1xf32>
    %17 = arith.addf %15, %16 : vector<4x1xf32>
    %18 = math.rsqrt %17 : vector<4x1xf32>
    %19 = arith.mulf %3, %18 : vector<4x1xf32>
    %20 = vector.broadcast %19 : vector<4x1xf32> to vector<4x128xf32>
    %21 = arith.mulf %10, %20 : vector<4x128xf32>
    %22 = vector.broadcast %4 : vector<4x1xf32> to vector<4x128xf32>
    %23 = arith.addf %21, %22 : vector<4x128xf32>
    %c0_12 = arith.constant 0 : index
    %c0_13 = arith.constant 0 : index
    %24 = vector.load %arg5[%c0_12, %c0_13] : memref<128x512xf32, #tpu.memory_space<vmem>>, vector<128x512xf32>
    %cst_14 = arith.constant dense<0.000000e+00> : vector<4x512xf32>
    %25 = tpu.matmul %23, %24, %cst_14 {dimension_numbers = #tpu.dot_dimension_numbers<[1], [0], [0], [1], [0, 0, 1, 1], [], []>} : vector<4x128xf32>, vector<128x512xf32>, vector<4x512xf32> -> vector<4x512xf32>
    %c0_15 = arith.constant 0 : index
    %c0_16 = arith.constant 0 : index
    %26 = vector.load %arg6[%c0_15, %c0_16] : memref<4x512xf32, #tpu.memory_space<vmem>>, vector<4x512xf32>
    %27 = arith.addf %25, %26 : vector<4x512xf32>
    %c0_17 = arith.constant 0 : index
    %c0_18 = arith.constant 0 : index
    %28 = vector.load %arg7[%c0_17, %c0_18] : memref<4x512xf32, #tpu.memory_space<vmem>>, vector<4x512xf32>
    tpu.vector_store %arg7[%c0_17, %c0_18], %27 {strides = array<i32>} : memref<4x512xf32, #tpu.memory_space<vmem>>, vector<4x512xf32>,
    return
  }
  func.func @transform_0(%arg0: i32) -> (i32, i32) {
    %c0_i32 = arith.constant 0 : i32
    %c0_i32_0 = arith.constant 0 : i32
    %c0_i32_1 = arith.constant 0 : i32
    return %c0_i32, %c0_i32_0 : i32, i32
  }
  func.func @transform_1(%arg0: i32) -> (i32, i32) {
    %c0_i32 = arith.constant 0 : i32
    %c0_i32_0 = arith.constant 0 : i32
    %c0_i32_1 = arith.constant 0 : i32
    return %c0_i32, %c0_i32_0 : i32, i32
  }
  func.func @transform_2(%arg0: i32) -> (i32, i32) {
    %c0_i32 = arith.constant 0 : i32
    %c0_i32_0 = arith.constant 0 : i32
    %c0_i32_1 = arith.constant 0 : i32
    return %c0_i32, %c0_i32_0 : i32, i32
  }
  func.func @transform_3(%arg0: i32) -> (i32, i32) {
    %c0_i32 = arith.constant 0 : i32
    %c0_i32_0 = arith.constant 0 : i32
    %c0_i32_1 = arith.constant 0 : i32
    return %c0_i32, %c0_i32_0 : i32, i32
  }
  func.func @transform_4(%arg0: i32) -> (i32, i32) {
    %c0_i32 = arith.constant 0 : i32
    %c0_i32_0 = arith.constant 0 : i32
    %c0_i32_1 = arith.constant 0 : i32
    return %c0_i32, %c0_i32_0 : i32, i32
  }
  func.func @transform_5(%arg0: i32) -> (i32, i32) {
    %c0_i32 = arith.constant 0 : i32
    %c0_i32_0 = arith.constant 0 : i32
    %c0_i32_1 = arith.constant 0 : i32
    return %c0_i32, %c0_i32_0 : i32, i32
  }
  func.func @transform_6(%arg0: i32) -> (i32, i32) {
    %c0_i32 = arith.constant 0 : i32
    %c0_i32_0 = arith.constant 0 : i32
    %c0_i32_1 = arith.constant 0 : i32
    return %c0_i32, %c0_i32_0 : i32, i32
  }
}

</mosaic_0001>

<bundles_post_ra>
// kernel: tpu_custom_call.1
= control target key start
LH: loop header
LB: loop body
LE: loop exit
PB: predicated region body
PF: predicated region fallthrough
CT: control target
= control target key end

     0   :  { %11 = vsyncpa [#allocation3], 0  ;;  %s604_s0 = inlined_call_operand.vmem [shape: f32[8,128], index: 0, kind: input, shape index: {}]   ;;  %s605_s1 = inlined_call_operand.vmem [shape: f32[4,8], index: 1, kind: input, shape index: {}]   ;;  %s606_s2 = inlined_call_operand.vmem [shape: f32[4,1], index: 2, kind: input, shape index: {}]   ;;  %s607_s3 = inlined_call_operand.vmem [shape: f32[4,1], index: 3, kind: input, shape index: {}]   ;;  %s608_s4 = inlined_call_operand.hbm [shape: f32[128,512], index: 4, kind: input, shape index: {}]   ;;  %s609_s5 = inlined_call_operand.vmem [shape: f32[4,512], index: 5, kind: input, shape index: {}]   ;;  %s610_s6 = inlined_call_operand.hbm [shape: f32[4,512], index: 6, kind: output, shape index: {}]  }
   0x1   :  { %12 = vsyncpa [#allocation4], 0  ;;  %s515_s21 = smov [#allocation2]   ;;  %s467_s25 = scalar_lea.hbm %s608_s4, 8192 }
   0x2   :  { %s26_s22 = sshll.u32 %s515_s21, 4  ;;  %p468_p0 = scmp.ne.s32.totalorder %s608_s4, %s467_s25  ;;  %s27_s22 = int_to_ptr.vmem [resolvable:$true] %s26_s22 }
   0x3   :  { %p471_p1 = scmp.lt.u32.totalorder %s467_s25, %s608_s4 }
   0x5   :  { %p473_p2 = pnand %p471_p1, %p468_p0 }
   0x7   :  { %476 = shalt.err (!%p473_p2)
}
   0x8   :  { %s477_s30 = scalar_lea.vmem %s27_s22, 8192  ;;  %p482_p4 = scmp.lt.s32.totalorder %s27_s22, %s27_s22 }
   0x9   :  { %p478_p3 = scmp.ne.s32.totalorder %s27_s22, %s477_s30  ;;  %p483_p5 = scmp.lt.s32.totalorder %s477_s30, %s477_s30 }
   0xb   :  { %p484_p6 = por %p483_p5, %p482_p4 }
   0xd   :  { %p485_p7 = pnand %p484_p6, %p478_p3 }
   0xf   :  { %488 = shalt.err (!%p485_p7)
}
  0x10   :  { %s516_s7 = smov 512   ;;  %s517_s8 = smov 32  }
  0x11   :  { %32 = dma.hbm_to_vmem [thread:$0]  %s608_s4, 8192, %s27_s22, [#allocation3], %s516_s7, %s516_s7, %s517_s8  }
  0x12   :  { %511 = dma.done.wait [#allocation3], 8192  }
  0x13   :  { %512 = vsyncadd [#allocation3], 4294959104  ;;  %v518_v0 = vmov 0.0   ;;  %vm519_vm0 = vmmov 0   ;;  %vm40_vm1 = vcmask 64512   ;;  %v39_v1 = vld [vmem:[%s604_s0] sm:$0xff] }
  0x14   :  { %385 = vmatprep.subr.mxu0 %v518_v0  ;;  %387 = vmatprep.mubr.msk.f32.mxu0 %vm519_vm0, %v518_v0  ;;  %v38_v2 = vld [vmem:[%s605_s1] sm:$0xf]  ;;  %vm116_vm2 = vcmask 1043456   ;;  %v520_v11 = vmov 0   ;;  %v144_v12 = vld [vmem:[#allocation2 + $0x8] sm:$0xff]  ;;  %v146_v14 = vld [vmem:[#allocation2 + $0x18] sm:$0xff] }
  0x15   :  { %279 = vmatprep.mubr.f32.mxu1 %v518_v0  ;;  %386 = vmatpush3.msra.mxu0 %v39_v1  ;;  %v148_v13 = vld [vmem:[#allocation2 + $0x28] sm:$0xff]  ;;  %v150_v16 = vld [vmem:[#allocation2 + $0x38] sm:$0xff]  ;;  %v143_v17 = vld [vmem:[#allocation2] sm:$0xff]  ;;  %s521_s18 = smov [#allocation5]  }
  0x16   :  { %388 = vmatmul.mubr.msk.f32.vlgmr.msra.gmra.mrb[0].mxu0 %vm40_vm1, %v38_v2  ;;  %461 = vset.pattern.permute.xlu1 %v520_v11  ;;  %v390_v15 = vpack.c.bf16 %v148_v13, %v144_v12  ;;  %v147_v18 = vld [vmem:[#allocation2 + $0x20] sm:$0xff]  ;;  %v422_v19 = vpack.c.bf16 %v150_v16, %v146_v14  ;;  %v145_v21 = vld [vmem:[#allocation2 + $0x10] sm:$0xff]  ;;  %v152_v23 = vld [vmem:[#allocation2 + $0x48] sm:$0xff]  ;;  %s373_s19 = sshll.u32 %s521_s18, 4  ;;  %s374_s19 = int_to_ptr.vmem [resolvable:$true] %s373_s19 }
  0x17   :  { %350 = vmatprep.mubr.f32.mxu0 %v518_v0  ;;  %462 = vset.pattern.permute.xlu0 %v520_v11  ;;  %v392_v20 = vpack.c.bf16 %v147_v18, %v143_v17  ;;  %v149_v22 = vld [vmem:[#allocation2 + $0x30] sm:$0xff]  ;;  %v156_v25 = vld [vmem:[#allocation2 + $0x68] sm:$0xff]  ;;  %v154_v26 = vld [vmem:[#allocation2 + $0x58] sm:$0xff]  ;;  %s489_s20 = scalar_lea.vmem %s374_s19, 256  ;;  %p494_p9 = scmp.lt.s32.totalorder %s374_s19, %s374_s19 }
  0x18   :  { %391 = vmatprep.subr.bf16.mxu1 %v390_v15  ;;  %v424_v24 = vpack.c.bf16 %v149_v22, %v145_v21  ;;  %v158_v27 = vld [vmem:[#allocation2 + $0x78] sm:$0xff]  ;;  %423 = vmatprep.subr.bf16.mxu0 %v422_v19  ;;  %v394_v28 = vpack.c.bf16 %v156_v25, %v152_v23  ;;  %v151_v30 = vld [vmem:[#allocation2 + $0x40] sm:$0xff]  ;;  %v153_v32 = vld [vmem:[#allocation2 + $0x50] sm:$0xff]  ;;  %p490_p8 = scmp.ne.s32.totalorder %s374_s19, %s489_s20  ;;  %p495_p10 = scmp.lt.s32.totalorder %s489_s20, %s489_s20 }
  0x19   :  { %393 = vmatpush1.bf16.msra.mxu1 %v392_v20  ;;  %v426_v29 = vpack.c.bf16 %v158_v27, %v154_v26  ;;  %v155_v31 = vld [vmem:[#allocation2 + $0x60] sm:$0xff]  ;;  %v157_v34 = vld [vmem:[#allocation2 + $0x70] sm:$0xff]  ;;  %v160_v35 = vld [vmem:[#allocation2 + $0x88] sm:$0xff] }
  0x1a   :  { %425 = vmatpush1.bf16.msra.mxu0 %v424_v24  ;;  %v396_v33 = vpack.c.bf16 %v155_v31, %v151_v30  ;;  %v164_v36 = vld [vmem:[#allocation2 + $0xa8] sm:$0xff]  ;;  %395 = vmatprep.subr.bf16.mxu1 %v394_v28  ;;  %v428_v37 = vpack.c.bf16 %v157_v34, %v153_v32  ;;  %v162_v39 = vld [vmem:[#allocation2 + $0x98] sm:$0xff]  ;;  %v159_v41 = vld [vmem:[#allocation2 + $0x80] sm:$0xff]  ;;  %p496_p11 = por %p495_p10, %p494_p9 }
  0x1b   :  { %427 = vmatprep.subr.bf16.mxu0 %v426_v29  ;;  %v398_v38 = vpack.c.bf16 %v164_v36, %v160_v35  ;;  %v166_v40 = vld [vmem:[#allocation2 + $0xb8] sm:$0xff]  ;;  %v163_v43 = vld [vmem:[#allocation2 + $0xa0] sm:$0xff]  ;;  %v161_v44 = vld [vmem:[#allocation2 + $0x90] sm:$0xff] }
  0x1c   :  { %v430_v42 = vpack.c.bf16 %v166_v40, %v162_v39  ;;  %v165_v45 = vld [vmem:[#allocation2 + $0xb0] sm:$0xff]  ;;  %v400_v46 = vpack.c.bf16 %v163_v43, %v159_v41  ;;  %v168_v47 = vld [vmem:[#allocation2 + $0xc8] sm:$0xff]  ;;  %v170_v49 = vld [vmem:[#allocation2 + $0xd8] sm:$0xff]  ;;  %p497_p12 = pnand %p496_p11, %p490_p8 }
  0x1d   :  { %397 = vmatpush1.bf16.msra.mxu1 %v396_v33  ;;  %v172_v48 = vld [vmem:[#allocation2 + $0xe8] sm:$0xff]  ;;  %v432_v50 = vpack.c.bf16 %v165_v45, %v161_v44  ;;  %v174_v52 = vld [vmem:[#allocation2 + $0xf8] sm:$0xff]  ;;  %v167_v53 = vld [vmem:[#allocation2 + $0xc0] sm:$0xff] }
  0x1e   :  { %429 = vmatpush1.bf16.msra.mxu0 %v428_v37  ;;  %399 = vmatprep.subr.bf16.mxu1 %v398_v38  ;;  %v402_v51 = vpack.c.bf16 %v172_v48, %v168_v47  ;;  %v171_v54 = vld [vmem:[#allocation2 + $0xe0] sm:$0xff]  ;;  %v434_v55 = vpack.c.bf16 %v174_v52, %v170_v49  ;;  %v169_v56 = vld [vmem:[#allocation2 + $0xd0] sm:$0xff]  ;;  %v176_v58 = vld [vmem:[#allocation2 + $0x108] sm:$0xff] }
  0x1f   :  { %431 = vmatprep.subr.bf16.mxu0 %v430_v42  ;;  %v173_v57 = vld [vmem:[#allocation2 + $0xf0] sm:$0xff]  ;;  %v180_v59 = vld [vmem:[#allocation2 + $0x128] sm:$0xff]  ;;  %v178_v60 = vld [vmem:[#allocation2 + $0x118] sm:$0xff]  ;;  %v404_v62 = vpack.c.bf16 %v171_v54, %v167_v53 }
  0x20   :  { %v182_v61 = vld [vmem:[#allocation2 + $0x138] sm:$0xff]  ;;  %v436_v63 = vpack.c.bf16 %v173_v57, %v169_v56  ;;  %v406_v0 = vpack.c.bf16 %v180_v59, %v176_v58  ;;  %v175_v1 = vld [vmem:[#allocation2 + $0x100] sm:$0xff]  ;;  %v185_v16 = vld [vmem:[#allocation2 + $0x150] sm:$0xff] }
  0x21   :  { %401 = vmatpush1.bf16.msra.mxu1 %v400_v46  ;;  %v179_v2 = vld [vmem:[#allocation2 + $0x120] sm:$0xff]  ;;  %v189_v18 = vld [vmem:[#allocation2 + $0x170] sm:$0xff]  ;;  %v192_v19 = vld [vmem:[#allocation2 + $0x188] sm:$0xff] }
  0x22   :  { %433 = vmatpush1.bf16.msra.mxu0 %v432_v50  ;;  %403 = vmatprep.subr.bf16.mxu1 %v402_v51  ;;  %v408_v11 = vpack.c.bf16 %v179_v2, %v175_v1  ;;  %v183_v14 = vld [vmem:[#allocation2 + $0x140] sm:$0xff]  ;;  %v196_v20 = vld [vmem:[#allocation2 + $0x1a8] sm:$0xff]  ;;  %v194_v21 = vld [vmem:[#allocation2 + $0x198] sm:$0xff]  ;;  %v444_v24 = vpack.c.bf16 %v189_v18, %v185_v16 }
  0x23   :  { %435 = vmatprep.subr.bf16.mxu0 %v434_v55  ;;  %v187_v15 = vld [vmem:[#allocation2 + $0x160] sm:$0xff]  ;;  %v198_v22 = vld [vmem:[#allocation2 + $0x1b8] sm:$0xff]  ;;  %v414_v25 = vpack.c.bf16 %v196_v20, %v192_v19  ;;  %v193_v29 = vld [vmem:[#allocation2 + $0x190] sm:$0xff] }
  0x24   :  { %v412_v23 = vpack.c.bf16 %v187_v15, %v183_v14  ;;  %v191_v26 = vld [vmem:[#allocation2 + $0x180] sm:$0xff]  ;;  %v446_v28 = vpack.c.bf16 %v198_v22, %v194_v21  ;;  %v197_v30 = vld [vmem:[#allocation2 + $0x1b0] sm:$0xff]  ;;  %v200_v39 = vld [vmem:[#allocation2 + $0x1c8] sm:$0xff] }
  0x25   :  { %405 = vmatpush1.bf16.msra.mxu1 %v404_v62  ;;  %v195_v27 = vld [vmem:[#allocation2 + $0x1a0] sm:$0xff]  ;;  %v448_v32 = vpack.c.bf16 %v197_v30, %v193_v29  ;;  %v204_v40 = vld [vmem:[#allocation2 + $0x1e8] sm:$0xff]  ;;  %v202_v41 = vld [vmem:[#allocation2 + $0x1d8] sm:$0xff] }
  0x26   :  { %437 = vmatpush1.bf16.msra.mxu0 %v436_v63  ;;  %407 = vmatprep.subr.bf16.mxu1 %v406_v0  ;;  %v416_v31 = vpack.c.bf16 %v195_v27, %v191_v26  ;;  %v114_v36 = vld [vmem:[%s606_s2] sm:$0xf]  ;;  %v418_v42 = vpack.c.bf16 %v204_v40, %v200_v39  ;;  %v206_v43 = vld [vmem:[#allocation2 + $0x1f8] sm:$0xff]  ;;  %v201_v49 = vld [vmem:[#allocation2 + $0x1d0] sm:$0xff] }
  0x27   :  { %v199_v44 = vld [vmem:[#allocation2 + $0x1c0] sm:$0xff]  ;;  %v450_v47 = vpack.c.bf16 %v206_v43, %v202_v41  ;;  %v205_v50 = vld [vmem:[#allocation2 + $0x1f0] sm:$0xff]  ;;  %v208_v57 = vld [vmem:[%s609_s5 + $0x8] sm:$0xff] }
  0x28   :  { %v203_v45 = vld [vmem:[#allocation2 + $0x1e0] sm:$0xff]  ;;  %v452_v51 = vpack.c.bf16 %v205_v50, %v201_v49  ;;  %v212_v59 = vcombine.high %v208_v57, %v208_v57 }
  0x29   :  { %409 = vmatpush1.bf16.msra.mxu1 %v408_v11  ;;  %v115_v46 = vld [vmem:[%s607_s3] sm:$0xf]  ;;  %v420_v48 = vpack.c.bf16 %v203_v45, %v199_v44 }
  0x2a   :  { %v207_v56 = vld [vmem:[%s609_s5] sm:$0xff] }
  0x2b   :  { %v211_v58 = vcombine.high %v207_v56, %v207_v56 }
  0xe9   :  { %v110_v3 = vpop.f32.mrb[0].mxu0 }
  0xea   :  { %v389_v4 = vpop.f32.mrb[1].mxu0  ;;  %v117_v5 = vsel %vm116_vm2, %v110_v3, 0.0 }
  0xeb   :  { %118 = vadd.xlane.f32.xlu0 %v117_v5  ;;  %v438_v4 = vpack.c.bf16 %v182_v61, %v178_v60  ;;  %v181_v5 = vld [vmem:[#allocation2 + $0x130] sm:$0xff] }
  0xed   :  { %439 = vmatprep.subr.bf16.mxu0 %v438_v4 }
 0x178   :  { %v119_v6 = vpop.xlane.xlu0 %118 }
 0x179   :  { %v121_v7 = vmul.f32 0.0078125, %v119_v6  ;;  %v184_v6 = vld [vmem:[#allocation2 + $0x148] sm:$0xff] }
 0x17b   :  { %v575_v8 = vsub.f32 %v110_v3, %v121_v7  ;;  %v177_v3 = vld [vmem:[#allocation2 + $0x110] sm:$0xff]  ;;  %v188_v7 = vld [vmem:[#allocation2 + $0x168] sm:$0xff] }
 0x17c   :  { %v440_v12 = vpack.c.bf16 %v181_v5, %v177_v3  ;;  %v410_v13 = vpack.c.bf16 %v188_v7, %v184_v6 }
 0x17d   :  { %v123_v9 = vmul.f32 %v575_v8, %v575_v8 }
 0x17e   :  { %441 = vmatpush1.bf16.msra.mxu0 %v440_v12  ;;  %411 = vmatprep.subr.bf16.mxu1 %v410_v13 }
 0x17f   :  { %v124_v10 = vsel %vm116_vm2, %v123_v9, 0.0  ;;  %v186_v9 = vld [vmem:[#allocation2 + $0x158] sm:$0xff]  ;;  %413 = vmatpush1.bf16.msra.mxu1 %v412_v23 }
 0x180   :  { %125 = vadd.xlane.f32.xlu0 %v124_v10  ;;  %v190_v10 = vld [vmem:[#allocation2 + $0x178] sm:$0xff]  ;;  %415 = vmatprep.subr.bf16.mxu1 %v414_v25 }
 0x181   :  { %v442_v17 = vpack.c.bf16 %v190_v10, %v186_v9 }
 0x183   :  { %443 = vmatprep.subr.bf16.mxu0 %v442_v17  ;;  %417 = vmatpush1.bf16.msra.mxu1 %v416_v31 }
 0x184   :  { %445 = vmatpush1.bf16.msra.mxu0 %v444_v24  ;;  %419 = vmatprep.subr.bf16.mxu1 %v418_v42 }
 0x185   :  { %447 = vmatprep.subr.bf16.mxu0 %v446_v28 }
 0x187   :  { %421 = vmatpush1.bf16.msra.mxu1 %v420_v48 }
 0x188   :  { %449 = vmatpush1.bf16.msra.mxu0 %v448_v32 }
 0x189   :  { %451 = vmatprep.subr.bf16.mxu0 %v450_v47 }
 0x18c   :  { %453 = vmatpush1.bf16.msra.mxu0 %v452_v51 }
 0x20d   :  { %v126_v33 = vpop.xlane.xlu0 %125 }
 0x20e   :  { %v127_v34 = vmul.f32 0.0078125, %v126_v33 }
 0x210   :  { %v128_v35 = vadd.f32 1e-12, %v127_v34 }
 0x212   :  { %465 = vrsqrt.f32 %v128_v35 }
 0x21c   :  { %v466_v37 = vpop.eup %465 }
 0x21d   :  { %v130_v38 = vmul.f32 %v466_v37, %v114_v36 }
 0x21f   :  { %133 = vperm.xlu1 %461, %v130_v38  }
 0x223   :  { %139 = vperm.xlu1 %461, %v115_v46  }
 0x29e   :  { %v134_v52 = vpop.permute.xlu1 %133 }
 0x29f   :  { %v136_v53 = vmul.f32 %v134_v52, %v575_v8 }
 0x2a2   :  { %v140_v54 = vpop.permute.xlu1 %139 }
 0x2a3   :  { %v142_v55 = vadd.f32 %v140_v54, %v136_v53 }
 0x2a5   :  { %280 = vmatmul.mubr.f32.vlgmr.msra.gmra.mrb[0].mxu1 %v142_v55  ;;  %351 = vmatmul.mubr.f32.vlgmr.msra.gmra.mrb[2].mxu0 %v142_v55 }
 0x378   :  { %v281_v60 = vpop.f32.mrb[0].mxu1  ;;  %v352_v61 = vpop.f32.mrb[2].mxu0 }
 0x379   :  { %v282_v62 = vadd.f32 %v281_v60, %v207_v56  ;;  %v353_v63 = vadd.f32 %v352_v61, %v208_v57  ;;  %v283_v0 = vpop.f32.mrb[1].mxu1  ;;  %v354_v8 = vpop.f32.mrb[3].mxu0 }
 0x37a   :  { %v284_v1 = vadd.f32 %v283_v0, %v211_v58  ;;  %v355_v2 = vadd.f32 %v354_v8, %v212_v59 }
 0x37c   :  { %v361_v3 = vcombine.low %v282_v62, %v284_v1  ;;  %v362_v4 = vcombine.low %v353_v63, %v355_v2 }
 0x37e   :  { %365 = vst [vmem:[#allocation5] sm:$0xff] %v361_v3  ;;  %366 = vst [vmem:[#allocation5 + $0x8] sm:$0xff] %v362_v4 }
 0x37f   :  { %500 = shalt.err (!%p497_p12)
}
 0x380   :  { %s501_s22 = scalar_lea.hbm %s610_s6, 256 }
 0x381   :  { %p502_p13 = scmp.ne.s32.totalorder %s610_s6, %s501_s22  ;;  %p505_p0 = scmp.lt.u32.totalorder %s501_s22, %s610_s6 }
 0x383   :  { %p507_p1 = pnand %p505_p0, %p502_p13 }
 0x385   :  { %510 = shalt.err (!%p507_p1)
}
 0x386   :  { %376 = dma.vmem_to_hbm [thread:$0]  %s374_s19, 256, %s610_s6, [#allocation4]  }
 0x387   :  { %513 = dma.done.wait [#allocation4], 256  }
 0x388   :  { %514 = vsyncadd [#allocation4], 4294967040 }
 0x389   :  { %380 = vsyncpa [#allocation3], 1 }
 0x38a   :  { %381 = vsyncpa [#allocation4], 1 }

</bundles_post_ra>
